<compile_context>
chip_gen: v7x
topology: tpu7x:2x2x1
jax: 0.10.0
libtpu: 0.0.40
codegen_flags: <defaults>
</compile_context>

<pallas_src>
import functools

import jax
import jax.numpy as jnp
from jax import lax
from jax.experimental import pallas as pl
from jax.experimental.pallas import tpu as pltpu

EPS = 1e-5


def bottleneck_kernel(x_ref, m_ref,
                      w1d_ref, b1d_ref,
                      w2_ref, b2_ref,
                      w3_ref, b3_ref,
                      o_ref,
                      *, W, C1):
    x = x_ref[...]                                          # (Cin, L)
    L = x.shape[1]                                          # static
    masks = m_ref[...]                                      # (9, L) precomputed

    # --- conv1 (1x1) fused with identity-downsample (1x1): BN scale already ---
    # folded into w1d, BN shift in b1d -> one matmul + bias + ReLU.
    h = jnp.dot(w1d_ref[...], x, preferred_element_type=jnp.float32)
    h = jnp.maximum(h + b1d_ref[...], 0.0)                  # (C1+C3, L)
    h1 = h[:C1]                                             # conv2 input (C1, L)
    idn = h[C1:]                                            # residual   (C3, L)

    # --- conv2: 3x3, pad=1, stride=1 as one im2col matmul ---------------------
    # Shifted copies of h1 via lane rotation; wrap-around (image borders and
    # cross-image bleed, since L spans several images) is zeroed by the
    # precomputed per-lane masks.  Concatenated into a (9*C1, L) patch tensor,
    # then a single MXU matmul.  C1 is a multiple of 8 so the concat / split
    # stay on (8,128) tile boundaries.
    pieces = []
    idx = 0
    for dy in (-1, 0, 1):
        for dx in (-1, 0, 1):
            delta = dy * W + dx                             # flat spatial shift
            if delta == 0:
                sh = h1
            else:
                # result[p] = h1[(p + delta) mod L]; wrap removed by the mask.
                sh = pltpu.roll(h1, shift=(-delta) % L, axis=1)
            if not (dy == 0 and dx == 0):
                sh = sh * masks[idx:idx + 1, :]             # (1, L) broadcast
            pieces.append(sh)
            idx += 1
    patches = jnp.concatenate(pieces, axis=0)               # (9*C1, L)

    h2 = jnp.dot(w2_ref[...], patches, preferred_element_type=jnp.float32)
    h2 = jnp.maximum(h2 + b2_ref[...], 0.0)                 # (C2, L)

    # --- conv3: 1x1 + bias (no BN / ReLU before the residual add) -------------
    h3 = jnp.dot(w3_ref[...], h2, preferred_element_type=jnp.float32) + b3_ref[...]

    # --- residual add + final ReLU; lane-dense (C3, L) store ------------------
    o_ref[...] = jnp.maximum(h3 + idn, 0.0)


def _fold_bn(conv_b, gamma, beta, mean, var):
    """Returns (scale, bias) columns so that BN(conv(x)) == (W*scale) x + bias."""
    scale = gamma / jnp.sqrt(var + EPS)
    bias = (conv_b - mean) * scale + beta
    return scale.reshape(-1, 1), bias.reshape(-1, 1)        # (C, 1) columns


def _border_masks(H, W, Nb):
    """(9, Nb*H*W) float masks zeroing the roll wrap at image borders."""
    pos = jnp.arange(H * W, dtype=jnp.int32)
    yy = pos // W
    xx = pos % W
    rows = []
    for dy in (-1, 0, 1):
        for dx in (-1, 0, 1):
            valid = jnp.ones((H * W,), dtype=bool)
            if dy == -1:
                valid = valid & (yy >= 1)
            elif dy == 1:
                valid = valid & (yy <= H - 2)
            if dx == -1:
                valid = valid & (xx >= 1)
            elif dx == 1:
                valid = valid & (xx <= W - 2)
            rows.append(valid)
    masks = jnp.stack(rows, axis=0).astype(jnp.float32)     # (9, H*W)
    return jnp.tile(masks, (1, Nb))                         # (9, Nb*H*W)


def bottleneck_block(x_nchw, p, *, num_blocks=None):
    """x_nchw: (N, Cin, H, W) float32.  Returns (N, Cout, H, W).

    num_blocks: number of grid steps the batch is split into.
      Default 2 (if N is even) so v7x's two TensorCores each take half the
      batch via the "parallel" grid axis; use 1 on single-TC chips (v5e/v6e)
      to collapse the grid and put all N*H*W positions on the lane axis.
    """
    # TODO(synk): stride > 1 path (strided 3x3 / strided downsample) not implemented;
    # matches the module defaults (stride=1) used below.
    # TODO(synk): no-downsample variant (in_channels == out_1x1) not implemented.
    # TODO(synk): for production-size channels/spatial, cast matmul operands to
    # bf16, single-buffer the constant weight blocks, and tile the HW axis (with
    # a halo) to fit v7x's 64 MiB VMEM; irrelevant at this toy size.
    N, Cin, H, W = x_nchw.shape
    HW = H * W

    if num_blocks is None:
        num_blocks = 2 if (N % 2 == 0 and N >= 2) else 1
    if N % num_blocks != 0:
        num_blocks = 1
    Nb = N // num_blocks
    L = Nb * HW                                             # lanes per grid step

    # x -> (Cin, N*HW): channels on sublanes, batch*spatial on lanes.
    x_cl = x_nchw.reshape(N, Cin, HW).transpose(1, 0, 2).reshape(Cin, N * HW)

    C1 = p["conv1_w"].shape[0]
    C2 = p["conv2_w"].shape[0]
    C3 = p["conv3_w"].shape[0]

    # BN folds: scale into conv weights, shift into bias columns.
    s1, b1 = _fold_bn(p["conv1_b"], p["bn1_g"], p["bn1_b"], p["bn1_m"], p["bn1_v"])
    s2, b2 = _fold_bn(p["conv2_b"], p["bn2_g"], p["bn2_b"], p["bn2_m"], p["bn2_v"])
    sd, bd = _fold_bn(p["down_b"], p["bnd_g"], p["bnd_b"], p["bnd_m"], p["bnd_v"])

    # conv weights -> (Cout, K) matmul form (LHS); conv1 + downsample fused.
    w1 = p["conv1_w"].reshape(C1, Cin) * s1
    wd = p["down_w"].reshape(C3, Cin) * sd
    w1d = jnp.concatenate([w1, wd], axis=0)                 # (C1+C3, Cin)
    b1d = jnp.concatenate([b1, bd], axis=0)                 # (C1+C3, 1)
    w2 = jnp.transpose(p["conv2_w"], (0, 2, 3, 1)).reshape(C2, 9 * C1) * s2
    w3 = p["conv3_w"].reshape(C3, C2)                       # (C3, C2)
    b3 = p["conv3_b"].reshape(C3, 1)

    masks = _border_masks(H, W, Nb)                         # (9, L)

    kernel = functools.partial(bottleneck_kernel, W=W, C1=C1)
    full = lambda a: pl.BlockSpec(a.shape, lambda g: (0,) * a.ndim)

    out = pl.pallas_call(
        kernel,
        out_shape=jax.ShapeDtypeStruct((C3, N * HW), jnp.float32),
        grid=(num_blocks,),
        in_specs=[
            pl.BlockSpec((Cin, L), lambda g: (0, g)),
            full(masks),
            full(w1d), full(b1d),
            full(w2), full(b2),
            full(w3), full(b3),
        ],
        out_specs=pl.BlockSpec((C3, L), lambda g: (0, g)),
        compiler_params=pltpu.CompilerParams(
            dimension_semantics=("parallel",)),
    )(x_cl, masks, w1d, b1d, w2, b2, w3, b3)

    # (C3, N*HW) -> (N, C3, H, W)
    return out.reshape(C3, N, HW).transpose(1, 0, 2).reshape(N, C3, H, W)


# ----------------------------- reference (plain JAX) -------------------------
def _conv2d(x, w, b, stride=1, padding=0):
    out = lax.conv_general_dilated(
        x, w, (stride, stride), [(padding, padding)] * 2,
        dimension_numbers=("NCHW", "OIHW", "NCHW"))
    return out + b[None, :, None, None]


def _bn(x, g, be, m, v):
    return (x - m[None, :, None, None]) / jnp.sqrt(v[None, :, None, None] + EPS) \
        * g[None, :, None, None] + be[None, :, None, None]


def reference_forward(x, p):
    h = jnp.maximum(_bn(_conv2d(x, p["conv1_w"], p["conv1_b"]),
                        p["bn1_g"], p["bn1_b"], p["bn1_m"], p["bn1_v"]), 0.0)
    h = jnp.maximum(_bn(_conv2d(h, p["conv2_w"], p["conv2_b"], padding=1),
                        p["bn2_g"], p["bn2_b"], p["bn2_m"], p["bn2_v"]), 0.0)
    h = _conv2d(h, p["conv3_w"], p["conv3_b"])
    idn = jnp.maximum(_bn(_conv2d(x, p["down_w"], p["down_b"]),
                          p["bnd_g"], p["bnd_b"], p["bnd_m"], p["bnd_v"]), 0.0)
    return jnp.maximum(h + idn, 0.0)


# ----------------------------------- main -------------------------------------
if __name__ == "__main__":
    # BottleNeckBlock(in_channels=4, red_1x1=8, mid_3x3=8, out_1x1=16, stride=1)
    N, Cin, H, W = 2, 4, 16, 16
    C1, C2, C3 = 8, 8, 16

    key = jax.random.PRNGKey(0)
    keys = jax.random.split(key, 24)
    k = iter(keys)
    nrm = lambda shape, s=0.1: (s * jax.random.normal(next(k), shape)).astype(jnp.float32)

    params = {
        "conv1_w": nrm((C1, Cin, 1, 1)), "conv1_b": nrm((C1,)),
        "bn1_g": 1.0 + nrm((C1,)), "bn1_b": nrm((C1,)),
        "bn1_m": nrm((C1,)), "bn1_v": 0.5 + jnp.abs(nrm((C1,), 1.0)),
        "conv2_w": nrm((C2, C1, 3, 3)), "conv2_b": nrm((C2,)),
        "bn2_g": 1.0 + nrm((C2,)), "bn2_b": nrm((C2,)),
        "bn2_m": nrm((C2,)), "bn2_v": 0.5 + jnp.abs(nrm((C2,), 1.0)),
        "conv3_w": nrm((C3, C2, 1, 1)), "conv3_b": nrm((C3,)),
        "down_w": nrm((C3, Cin, 1, 1)), "down_b": nrm((C3,)),
        "bnd_g": 1.0 + nrm((C3,)), "bnd_b": nrm((C3,)),
        "bnd_m": nrm((C3,)), "bnd_v": 0.5 + jnp.abs(nrm((C3,), 1.0)),
    }

    x = jax.random.normal(next(k), (N, Cin, H, W), jnp.float32)

    out = jax.block_until_ready(bottleneck_block(x, params))
    ref = jax.block_until_ready(reference_forward(x, params))

    assert out.shape == (N, C3, H, W), out.shape
    assert jnp.allclose(out, ref, rtol=1e-3, atol=1e-3), \
        float(jnp.max(jnp.abs(out - ref)))

    # Also check the fully-collapsed (single grid step, all lanes) variant.
    out1 = jax.block_until_ready(bottleneck_block(x, params, num_blocks=1))
    assert jnp.allclose(out1, ref, rtol=1e-3, atol=1e-3), \
        float(jnp.max(jnp.abs(out1 - ref)))

    print("KERNEL_OK")
</pallas_src>

<mosaic_0001>
module attributes {stable_mosaic.version = 11 : i64} {
  func.func @bottleneck_kernel(%arg0: i32, %arg1: memref<4x256xf32, #tpu.memory_space<vmem>>, %arg2: memref<9x256xf32, #tpu.memory_space<vmem>>, %arg3: memref<24x4xf32, #tpu.memory_space<vmem>>, %arg4: memref<24x1xf32, #tpu.memory_space<vmem>>, %arg5: memref<8x72xf32, #tpu.memory_space<vmem>>, %arg6: memref<8x1xf32, #tpu.memory_space<vmem>>, %arg7: memref<16x8xf32, #tpu.memory_space<vmem>>, %arg8: memref<16x1xf32, #tpu.memory_space<vmem>>, %arg9: memref<16x256xf32, #tpu.memory_space<vmem>>) attributes {dimension_semantics = [#tpu.dimension_semantics<parallel>], iteration_bounds = array<i64: 2>, scalar_prefetch = 0 : i64, scratch_operands = 0 : i64, tpu.core_type = #tpu.core_type<tc>, window_params = [{transform_indices = @transform_0, window_bounds = array<i64: 4, 256>}, {pipeline_mode = #tpu.pipeline_mode<synchronous>, transform_indices = @transform_1, window_bounds = array<i64: 9, 256>}, {pipeline_mode = #tpu.pipeline_mode<synchronous>, transform_indices = @transform_2, window_bounds = array<i64: 24, 4>}, {pipeline_mode = #tpu.pipeline_mode<synchronous>, transform_indices = @transform_3, window_bounds = array<i64: 24, 1>}, {pipeline_mode = #tpu.pipeline_mode<synchronous>, transform_indices = @transform_4, window_bounds = array<i64: 8, 72>}, {pipeline_mode = #tpu.pipeline_mode<synchronous>, transform_indices = @transform_5, window_bounds = array<i64: 8, 1>}, {pipeline_mode = #tpu.pipeline_mode<synchronous>, transform_indices = @transform_6, window_bounds = array<i64: 16, 8>}, {pipeline_mode = #tpu.pipeline_mode<synchronous>, transform_indices = @transform_7, window_bounds = array<i64: 16, 1>}, {transform_indices = @transform_8, window_bounds = array<i64: 16, 256>}]} {
    %c0 = arith.constant 0 : index
    %c0_0 = arith.constant 0 : index
    %0 = vector.load %arg1[%c0, %c0_0] : memref<4x256xf32, #tpu.memory_space<vmem>>, vector<4x256xf32>
    %c0_1 = arith.constant 0 : index
    %c0_2 = arith.constant 0 : index
    %1 = vector.load %arg2[%c0_1, %c0_2] : memref<9x256xf32, #tpu.memory_space<vmem>>, vector<9x256xf32>
    %c0_3 = arith.constant 0 : index
    %c0_4 = arith.constant 0 : index
    %2 = vector.load %arg3[%c0_3, %c0_4] : memref<24x4xf32, #tpu.memory_space<vmem>>, vector<24x4xf32>
    %cst = arith.constant dense<0.000000e+00> : vector<24x256xf32>
    %3 = tpu.matmul %2, %0, %cst {dimension_numbers = #tpu.dot_dimension_numbers<[1], [0], [0], [1], [0, 0, 1, 1], [], []>} : vector<24x4xf32>, vector<4x256xf32>, vector<24x256xf32> -> vector<24x256xf32>
    %c0_5 = arith.constant 0 : index
    %c0_6 = arith.constant 0 : index
    %4 = vector.load %arg4[%c0_5, %c0_6] : memref<24x1xf32, #tpu.memory_space<vmem>>, vector<24x1xf32>
    %5 = vector.broadcast %4 : vector<24x1xf32> to vector<24x256xf32>
    %6 = arith.addf %3, %5 : vector<24x256xf32>
    %cst_7 = arith.constant 0.000000e+00 : f32
    %7 = vector.broadcast %cst_7 : f32 to vector<24x256xf32>
    %8 = arith.maximumf %6, %7 : vector<24x256xf32>
    %9 = vector.extract_strided_slice %8 {offsets = [0, 0], sizes = [8, 256], strides = [1, 1]} : vector<24x256xf32> to vector<8x256xf32>
    %10 = vector.extract_strided_slice %8 {offsets = [8, 0], sizes = [16, 256], strides = [1, 1]} : vector<24x256xf32> to vector<16x256xf32>
    %c17_i32 = arith.constant 17 : i32
    %11 = tpu.dynamic_rotate %9 by %c17_i32 dim 1 : vector<8x256xf32>, i32 -> vector<8x256xf32>
    %12 = vector.extract_strided_slice %1 {offsets = [0, 0], sizes = [1, 256], strides = [1, 1]} : vector<9x256xf32> to vector<1x256xf32>
    %13 = vector.broadcast %12 : vector<1x256xf32> to vector<8x256xf32>
    %14 = arith.mulf %11, %13 : vector<8x256xf32>
    %c16_i32 = arith.constant 16 : i32
    %15 = tpu.dynamic_rotate %9 by %c16_i32 dim 1 : vector<8x256xf32>, i32 -> vector<8x256xf32>
    %16 = vector.extract_strided_slice %1 {offsets = [1, 0], sizes = [1, 256], strides = [1, 1]} : vector<9x256xf32> to vector<1x256xf32>
    %17 = vector.broadcast %16 : vector<1x256xf32> to vector<8x256xf32>
    %18 = arith.mulf %15, %17 : vector<8x256xf32>
    %c15_i32 = arith.constant 15 : i32
    %19 = tpu.dynamic_rotate %9 by %c15_i32 dim 1 : vector<8x256xf32>, i32 -> vector<8x256xf32>
    %20 = vector.extract_strided_slice %1 {offsets = [2, 0], sizes = [1, 256], strides = [1, 1]} : vector<9x256xf32> to vector<1x256xf32>
    %21 = vector.broadcast %20 : vector<1x256xf32> to vector<8x256xf32>
    %22 = arith.mulf %19, %21 : vector<8x256xf32>
    %c1_i32 = arith.constant 1 : i32
    %23 = tpu.dynamic_rotate %9 by %c1_i32 dim 1 : vector<8x256xf32>, i32 -> vector<8x256xf32>
    %24 = vector.extract_strided_slice %1 {offsets = [3, 0], sizes = [1, 256], strides = [1, 1]} : vector<9x256xf32> to vector<1x256xf32>
    %25 = vector.broadcast %24 : vector<1x256xf32> to vector<8x256xf32>
    %26 = arith.mulf %23, %25 : vector<8x256xf32>
    %c255_i32 = arith.constant 255 : i32
    %27 = tpu.dynamic_rotate %9 by %c255_i32 dim 1 : vector<8x256xf32>, i32 -> vector<8x256xf32>
    %28 = vector.extract_strided_slice %1 {offsets = [5, 0], sizes = [1, 256], strides = [1, 1]} : vector<9x256xf32> to vector<1x256xf32>
    %29 = vector.broadcast %28 : vector<1x256xf32> to vector<8x256xf32>
    %30 = arith.mulf %27, %29 : vector<8x256xf32>
    %c241_i32 = arith.constant 241 : i32
    %31 = tpu.dynamic_rotate %9 by %c241_i32 dim 1 : vector<8x256xf32>, i32 -> vector<8x256xf32>
    %32 = vector.extract_strided_slice %1 {offsets = [6, 0], sizes = [1, 256], strides = [1, 1]} : vector<9x256xf32> to vector<1x256xf32>
    %33 = vector.broadcast %32 : vector<1x256xf32> to vector<8x256xf32>
    %34 = arith.mulf %31, %33 : vector<8x256xf32>
    %c240_i32 = arith.constant 240 : i32
    %35 = tpu.dynamic_rotate %9 by %c240_i32 dim 1 : vector<8x256xf32>, i32 -> vector<8x256xf32>
    %36 = vector.extract_strided_slice %1 {offsets = [7, 0], sizes = [1, 256], strides = [1, 1]} : vector<9x256xf32> to vector<1x256xf32>
    %37 = vector.broadcast %36 : vector<1x256xf32> to vector<8x256xf32>
    %38 = arith.mulf %35, %37 : vector<8x256xf32>
    %c239_i32 = arith.constant 239 : i32
    %39 = tpu.dynamic_rotate %9 by %c239_i32 dim 1 : vector<8x256xf32>, i32 -> vector<8x256xf32>
    %40 = vector.extract_strided_slice %1 {offsets = [8, 0], sizes = [1, 256], strides = [1, 1]} : vector<9x256xf32> to vector<1x256xf32>
    %41 = vector.broadcast %40 : vector<1x256xf32> to vector<8x256xf32>
    %42 = arith.mulf %39, %41 : vector<8x256xf32>
    %43 = tpu.concatenate %14, %18, %22, %26, %9, %30, %34, %38, %42 in 0 : vector<8x256xf32>, vector<8x256xf32>, vector<8x256xf32>, vector<8x256xf32>, vector<8x256xf32>, vector<8x256xf32>, vector<8x256xf32>, vector<8x256xf32>, vector<8x256xf32> -> vector<72x256xf32>
    %c0_8 = arith.constant 0 : index
    %c0_9 = arith.constant 0 : index
    %44 = vector.load %arg5[%c0_8, %c0_9] : memref<8x72xf32, #tpu.memory_space<vmem>>, vector<8x72xf32>
    %cst_10 = arith.constant dense<0.000000e+00> : vector<8x256xf32>
    %45 = tpu.matmul %44, %43, %cst_10 {dimension_numbers = #tpu.dot_dimension_numbers<[1], [0], [0], [1], [0, 0, 1, 1], [], []>} : vector<8x72xf32>, vector<72x256xf32>, vector<8x256xf32> -> vector<8x256xf32>
    %c0_11 = arith.constant 0 : index
    %c0_12 = arith.constant 0 : index
    %46 = vector.load %arg6[%c0_11, %c0_12] : memref<8x1xf32, #tpu.memory_space<vmem>>, vector<8x1xf32>
    %47 = vector.broadcast %46 : vector<8x1xf32> to vector<8x256xf32>
    %48 = arith.addf %45, %47 : vector<8x256xf32>
    %cst_13 = arith.constant 0.000000e+00 : f32
    %49 = vector.broadcast %cst_13 : f32 to vector<8x256xf32>
    %50 = arith.maximumf %48, %49 : vector<8x256xf32>
    %c0_14 = arith.constant 0 : index
    %c0_15 = arith.constant 0 : index
    %51 = vector.load %arg7[%c0_14, %c0_15] : memref<16x8xf32, #tpu.memory_space<vmem>>, vector<16x8xf32>
    %cst_16 = arith.constant dense<0.000000e+00> : vector<16x256xf32>
    %52 = tpu.matmul %51, %50, %cst_16 {dimension_numbers = #tpu.dot_dimension_numbers<[1], [0], [0], [1], [0, 0, 1, 1], [], []>} : vector<16x8xf32>, vector<8x256xf32>, vector<16x256xf32> -> vector<16x256xf32>
    %c0_17 = arith.constant 0 : index
    %c0_18 = arith.constant 0 : index
    %53 = vector.load %arg8[%c0_17, %c0_18] : memref<16x1xf32, #tpu.memory_space<vmem>>, vector<16x1xf32>
    %54 = vector.broadcast %53 : vector<16x1xf32> to vector<16x256xf32>
    %55 = arith.addf %52, %54 : vector<16x256xf32>
    %56 = arith.addf %55, %10 : vector<16x256xf32>
    %cst_19 = arith.constant 0.000000e+00 : f32
    %57 = vector.broadcast %cst_19 : f32 to vector<16x256xf32>
    %58 = arith.maximumf %56, %57 : vector<16x256xf32>
    %c0_20 = arith.constant 0 : index
    %c0_21 = arith.constant 0 : index
    %59 = vector.load %arg9[%c0_20, %c0_21] : memref<16x256xf32, #tpu.memory_space<vmem>>, vector<16x256xf32>
    tpu.vector_store %arg9[%c0_20, %c0_21], %58 {strides = array<i32>} : memref<16x256xf32, #tpu.memory_space<vmem>>, vector<16x256xf32>,
    return
  }
  func.func @transform_0(%arg0: i32) -> (i32, i32) {
    %c0_i32 = arith.constant 0 : i32
    %c0_i32_0 = arith.constant 0 : i32
    return %c0_i32, %arg0 : i32, i32
  }
  func.func @transform_1(%arg0: i32) -> (i32, i32) {
    %c0_i32 = arith.constant 0 : i32
    %c0_i32_0 = arith.constant 0 : i32
    %c0_i32_1 = arith.constant 0 : i32
    return %c0_i32, %c0_i32_0 : i32, i32
  }
  func.func @transform_2(%arg0: i32) -> (i32, i32) {
    %c0_i32 = arith.constant 0 : i32
    %c0_i32_0 = arith.constant 0 : i32
    %c0_i32_1 = arith.constant 0 : i32
    return %c0_i32, %c0_i32_0 : i32, i32
  }
  func.func @transform_3(%arg0: i32) -> (i32, i32) {
    %c0_i32 = arith.constant 0 : i32
    %c0_i32_0 = arith.constant 0 : i32
    %c0_i32_1 = arith.constant 0 : i32
    return %c0_i32, %c0_i32_0 : i32, i32
  }
  func.func @transform_4(%arg0: i32) -> (i32, i32) {
    %c0_i32 = arith.constant 0 : i32
    %c0_i32_0 = arith.constant 0 : i32
    %c0_i32_1 = arith.constant 0 : i32
    return %c0_i32, %c0_i32_0 : i32, i32
  }
  func.func @transform_5(%arg0: i32) -> (i32, i32) {
    %c0_i32 = arith.constant 0 : i32
    %c0_i32_0 = arith.constant 0 : i32
    %c0_i32_1 = arith.constant 0 : i32
    return %c0_i32, %c0_i32_0 : i32, i32
  }
  func.func @transform_6(%arg0: i32) -> (i32, i32) {
    %c0_i32 = arith.constant 0 : i32
    %c0_i32_0 = arith.constant 0 : i32
    %c0_i32_1 = arith.constant 0 : i32
    return %c0_i32, %c0_i32_0 : i32, i32
  }
  func.func @transform_7(%arg0: i32) -> (i32, i32) {
    %c0_i32 = arith.constant 0 : i32
    %c0_i32_0 = arith.constant 0 : i32
    %c0_i32_1 = arith.constant 0 : i32
    return %c0_i32, %c0_i32_0 : i32, i32
  }
  func.func @transform_8(%arg0: i32) -> (i32, i32) {
    %c0_i32 = arith.constant 0 : i32
    %c0_i32_0 = arith.constant 0 : i32
    return %c0_i32, %arg0 : i32, i32
  }
}

</mosaic_0001>

<bundles_post_ra>
// kernel: tpu_custom_call.1
= control target key start
LH: loop header
LB: loop body
LE: loop exit
PB: predicated region body
PF: predicated region fallthrough
CT: control target
= control target key end

     0   :  { %13 = vsyncpa [#allocation3], 0  ;;  %s1305_s0 = inlined_call_operand.vmem [shape: f32[4,512], index: 0, kind: input, shape index: {}]   ;;  %s1306_s1 = inlined_call_operand.vmem [shape: f32[9,256], index: 1, kind: input, shape index: {}]   ;;  %s1307_s2 = inlined_call_operand.vmem [shape: f32[24,4], index: 2, kind: input, shape index: {}]   ;;  %s1308_s3 = inlined_call_operand.vmem [shape: f32[24,1], index: 3, kind: input, shape index: {}]   ;;  %s1309_s4 = inlined_call_operand.vmem [shape: f32[8,72], index: 4, kind: input, shape index: {}]   ;;  %s1310_s5 = inlined_call_operand.vmem [shape: f32[8,1], index: 5, kind: input, shape index: {}]   ;;  %s1311_s6 = inlined_call_operand.vmem [shape: f32[16,8], index: 6, kind: input, shape index: {}]   ;;  %s1312_s7 = inlined_call_operand.vmem [shape: f32[16,1], index: 7, kind: input, shape index: {}]   ;;  %s1313_s8 = inlined_call_operand.hbm [shape: f32[16,512], index: 8, kind: output, shape index: {}]  }
   0x1   :  { %15 = vsyncpa [#allocation3 + $0x1], 0  ;;  %s1062_s27 = smov 0   ;;  %s1064_s28 = smov 0  }
   0x2   :  { %s1066_s29 = smov 0   ;;  %s1068_s30 = smov 0  }
   0x3 LB: > { %s1083_s9 = sadd.s32 4294967295, %s1002_s30   ;;  %s847_s10 = sadd.s32 4294967294, %s1002_s30   ;;  %s1002_s30 = sphi %s1068_s30, %s1319_s30   ;;  %s998_s29 = sphi %s1066_s29, %s1318_s29   ;;  %s994_s28 = sphi %s1064_s28, %s1317_s28   ;;  %s990_s27 = sphi %s1062_s27, %s1316_s27  }
   0x4   : > { %s1087_s11 = sadd.s32 1, %s1002_s30   ;;  %s201_s12 = sadd.s32 1, %s998_s29 }
   0x5   : > { %s198_s13 = ssub.s32 %s1002_s30, %s1087_s11  ;;  %p211_p0 = scmp.ne.s32.totalorder %s998_s29, %s994_s28 }
   0x6   : > { %p199_p1 = scmp.eq.s32.totalorder %s198_s13, 0  ;;  %p212_p2 = scmp.eq.s32.totalorder %s1083_s9, 1 }
   0x7   : > { %p217_p3 = scmp.ne.s32.totalorder %s994_s28, %s990_s27  ;;  %p218_p4 = scmp.eq.s32.totalorder %s847_s10, 1 }
   0x8   : > { %s1098_s14 = scalar_select %p199_p1, %s998_s29, %s201_s12  }
   0x9   : > { %p1100_p5 = por %p212_p2, %p211_p0  ;;  %p1104_p6 = por %p218_p4, %p217_p3 }
   0xa   : > { %p850_p7 = scmp.ge.s32.totalorder %s1002_s30, 1  ;;  %p266_p8 = scmp.lt.s32.totalorder %s1002_s30, 3 }
   0xc   : > { %p267_p9 = pnand %p850_p7, %p266_p8 }
   0xd   : > { %s852_s17 = sshll.u32 (!%p267_p9), %s1083_s9, 1  ;;  %v1004_v0 = vmov (!%p267_p9), 0.0   ;;  %v1005_v1 = vmov (!%p267_p9), 0   ;;  %v315_v2 = vld [vmem:[%s1308_s3] sm:$0xff] (!%p267_p9)  ;;  %vm345_vm0 = vcmask (!%p267_p9), 1043456   ;;  %vm335_vm1 = vcmask (!%p267_p9), 31744  }
   0xe   : > { %270 = sbr.rel (%p267_p9) target bundleno = 852 (0x354), region = 52  ;;  %p301_p10 = scmp.lt.s32.totalorder (!%p267_p9), %s852_s17, 3  ;;  %414 = vmatprep.mubr.f32.mxu0 (!%p267_p9), %v1004_v0  ;;  %937 = vset.pattern.permute.xlu0 (!%p267_p9), %v1005_v1  ;;  %v312_v5 = vld [vmem:[%s1307_s2] sm:$0xff] (!%p267_p9)  ;;  %v313_v6 = vld [vmem:[%s1307_s2 + $0x8] sm:$0xff] (!%p267_p9)  ;;  %v314_v14 = vld [vmem:[%s1307_s2 + $0x10] sm:$0xff] (!%p267_p9)  ;;  %v443_v22 = vlaneseq (!%p267_p9)  ;;  %vm584_vm10 = vcmask (!%p267_p9), 588800  }
   0xf   : > { %320 = vperm.xlu0 (!%p267_p9), %937, %v315_v2   ;;  %652 = vmatprep.mubr.f32.mxu1 (!%p267_p9), %v1004_v0  ;;  %s1006_s12 = smov (!%p267_p9), 16   ;;  %s1007_s13 = smov (!%p267_p9), 17   ;;  %v316_v17 = vld [vmem:[%s1308_s3 + $0x8] sm:$0xff] (!%p267_p9)  ;;  %v663_v18 = vld [vmem:[%s1312_s7] sm:$0xff] (!%p267_p9)  ;;  %v317_v20 = vld [vmem:[%s1308_s3 + $0x10] sm:$0xff] (!%p267_p9)  ;;  %vm675_vm11 = vcmask (!%p267_p9), 64512  }
  0x10   : > { %938 = vset.pattern.permute.xlu1 (!%p267_p9), %v1005_v1  ;;  %s1009_s18 = smov (!%p267_p9), 1   ;;  %s1010_s19 = smov (!%p267_p9), 127   ;;  %v578_v19 = vld [vmem:[%s1310_s5] sm:$0xff] (!%p267_p9)  ;;  %v664_v21 = vld [vmem:[%s1312_s7 + $0x8] sm:$0xff] (!%p267_p9)  ;;  %v1175_v25 = vshrl.u32 (!%p267_p9), %v443_v22, 7  ;;  %v1177_v26 = vand.u32 (!%p267_p9), 127, %v443_v22 }
  0x11   : > { %s1013_s24 = smov (!%p267_p9), 111   ;;  %v1183_v30 = vld [vmem:[%s1306_s1] sm:$0xff] (!%p267_p9)  ;;  %v1188_v31 = vld [vmem:[%s1306_s1 + $0x8] sm:$0xff] (!%p267_p9)  ;;  %s297_s25 = sand.u32 (!%p267_p9), 1, %s994_s28  }
  0x12   : > { %v467_v28 = vsub.s32 (!%p267_p9), 1, %v1175_v25  ;;  %vm462_vm2 = vcmp.lt.s32.totalorder (!%p267_p9), %v1177_v26, 16  ;;  %v450_v32 = vsub.s32 (!%p267_p9), 0, %v1175_v25  ;;  %v501_v33 = vsub.s32 (!%p267_p9), 3, %v1175_v25  ;;  %s851_s26 = sshll.u32 (!%p267_p9), %s297_s25, 5  ;;  %s1014_s22 = smov (!%p267_p9), [#allocation2]  }
  0x13   : > { %v484_v34 = vsub.s32 (!%p267_p9), 2, %v1175_v25  ;;  %v518_v38 = vsub.s32 (!%p267_p9), 5, %v1175_v25  ;;  %vm479_vm3 = vcmp.lt.s32.totalorder (!%p267_p9), %v1177_v26, 15  ;;  %vm445_vm4 = vcmp.lt.s32.totalorder (!%p267_p9), %v1177_v26, 17  ;;  %s299_s10 = scalar_lea.vmem (!%p267_p9), [#allocation2], %s851_s26 }
  0x14   : > { %v468_v35 = vrot.slane (!%p267_p9), %v1183_v30, %v467_v28  ;;  %v472_v39 = vrot.slane (!%p267_p9), %v1188_v31, %v467_v28  ;;  %v451_v42 = vrot.slane (!%p267_p9), %v1183_v30, %v450_v32  ;;  %vm496_vm5 = vcmp.lt.s32.totalorder (!%p267_p9), %v1177_v26, 1 }
  0x15   : > { %s1321_s17 = smov (!%p301_p10, %s852_s17), 3  ;;  %v506_v43 = vrot.slane %v1188_v31, %v501_v33  ;;  %v455_v44 = vrot.slane %v1188_v31, %v450_v32  ;;  %v489_v45 = vrot.slane %v1188_v31, %v484_v34  ;;  %v502_v46 = vrot.slane %v1183_v30, %v501_v33 }
  0x16   : > { %s853_s20 = sshll.u32 %s1321_s17, 2  ;;  %s1008_s17 = smov 15   ;;  %vm513_vm6 = vcmp.lt.s32.totalorder %v1177_v26, 127  ;;  %v523_v50 = vrot.slane %v1188_v31, %v518_v38  ;;  %v485_v60 = vrot.slane %v1183_v30, %v484_v34  ;;  %vm530_vm7 = vcmp.lt.s32.totalorder %v1177_v26, 113 }
  0x17   : > { %s304_s23 = scalar_lea.vmem %s1305_s0, %s853_s20  ;;  %s1011_s20 = smov 113   ;;  %vm547_vm8 = vcmp.lt.s32.totalorder %v1177_v26, 112  ;;  %vm564_vm9 = vcmp.lt.s32.totalorder %v1177_v26, 111 }
  0x18   : > { %v307_v3 = vld [vmem:[%s304_s23] sm:$0xff]  ;;  %s1012_s23 = smov 112  }
  0x19   : > { %v334_v4 = vcombine.high %v307_v3, %v307_v3 }
  0x1b   : > { %854 = vmatprep.subr.msk.mxu0 %vm345_vm0, %v334_v4 }
  0x1c   : > { %855 = vmatpush1.msk.msra.mxu0 %vm345_vm0, %v307_v3 }
  0x1d   : > { %856 = vmatmul.mubr.msk.f32.vlgmr.msra.gmra.mrb[0].mxu0 %vm335_vm1, %v312_v5  ;;  %v519_v5 = vrot.slane %v1183_v30, %v518_v38 }
  0x1e   : > { %420 = vmatprep.mubr.f32.mxu0 %v1004_v0 }
  0x21   : > { %857 = vmatmul.mubr.msk.f32.gmra.mrb[2].mxu0 %vm335_vm1, %v313_v6 }
  0x22   : > { %426 = vmatprep.mubr.f32.mxu0 %v1004_v0 }
  0x25   : > { %858 = vmatmul.mubr.msk.f32.gmra.mrb[4].mxu0 %vm335_vm1, %v314_v14 }
  0x26   : > { %746 = vmatprep.mubr.f32.mxu0 %v1004_v0 }
  0x8e   : > { %v321_v7 = vpop.permute.xlu0 %320 }
  0xf0   : > { %v416_v8 = vpop.f32.mrb[0].mxu0 }
  0xf1   : > { %v417_v9 = vadd.f32 %v416_v8, %v321_v7  ;;  %v418_v10 = vpop.f32.mrb[1].mxu0 }
  0xf2   : > { %v419_v12 = vadd.f32 %v418_v10, %v321_v7  ;;  %v535_v7 = vsub.s32 6, %v1175_v25 }
  0xf3   : > { %v1129_v11 = vmax.f32 %v417_v9, 0.0 }
  0xf4   : > { %v1134_v13 = vmax.f32 %v419_v12, 0.0  ;;  %v1151_v15 = vpop.f32.mrb[2].mxu0  ;;  %v552_v12 = vsub.s32 7, %v1175_v25 }
  0xf5   : > { %458 = vrot.lane.b32.xlu1 %v1129_v11, %s1006_s12  ;;  %439 = vrot.lane.b32.xlu0 %v1129_v11, %s1007_s13  ;;  %v1153_v16 = vpop.f32.mrb[3].mxu0 }
  0xf6   : > { %v557_v25 = vrot.slane %v1188_v31, %v552_v12 }
  0xf9   : > { %475 = vrot.lane.b32.xlu1 %v1129_v11, %s1008_s17  ;;  %460 = vrot.lane.b32.xlu0 %v1134_v13, %s1006_s12 }
  0xfd   : > { %492 = vrot.lane.b32.xlu1 %v1129_v11, %s1009_s18  ;;  %477 = vrot.lane.b32.xlu0 %v1134_v13, %s1008_s17  ;;  %s869_s17 = sshll.u32 %s1083_s9, 8  ;;  %s1263_s9 = scalar_lea.sflag [#allocation3], %s297_s25 }
 0x101   : > { %441 = vrot.lane.b32.xlu1 %v1134_v13, %s1007_s13  ;;  %494 = vrot.lane.b32.xlu0 %v1134_v13, %s1009_s18  ;;  %s785_s13 = sshll.u32 %s299_s10, 4  ;;  %s1254_s13 = int_to_ptr.vmem [resolvable:$true] %s785_s13 }
 0x102   : > { %s940_s21 = scalar_lea.vmem %s1254_s13, 512 }
 0x103   : > { %p941_p11 = scmp.ne.s32.totalorder %s1254_s13, %s940_s21 }
 0x105   : > { %509 = vrot.lane.b32.xlu1 %v1129_v11, %s1010_s19  ;;  %511 = vrot.lane.b32.xlu0 %v1134_v13, %s1010_s19  ;;  %p942_p12 = pnand %p941_p11, %p1100_p5 }
 0x107   : > { %p943_p13 = pneg %p942_p12 }
 0x109   : > { %526 = vrot.lane.b32.xlu1 %v1129_v11, %s1011_s20  ;;  %528 = vrot.lane.b32.xlu0 %v1134_v13, %s1011_s20  ;;  %s1259_s20 = scalar_lea.hbm %s1313_s8, %s869_s17 }
 0x10d   : > { %543 = vrot.lane.b32.xlu1 %v1129_v11, %s1012_s23  ;;  %545 = vrot.lane.b32.xlu0 %v1134_v13, %s1012_s23  ;;  %s944_s23 = sshll.u32 %s1014_s22, 4  ;;  %s945_s23 = int_to_ptr.vmem [resolvable:$false] %s944_s23 }
 0x10e   : > { %p947_p0 = scmp.lt.s32.totalorder %s1254_s13, %s945_s23 }
 0x111   : > { %560 = vrot.lane.b32.xlu1 %v1129_v11, %s1013_s24  ;;  %562 = vrot.lane.b32.xlu0 %v1134_v13, %s1013_s24  ;;  %s946_s24 = scalar_lea.vmem %s945_s23, 1024 }
 0x112   : > { %p948_p1 = scmp.lt.s32.totalorder %s946_s24, %s940_s21 }
 0x114   : > { %p949_p2 = por %p948_p1, %p947_p0 }
 0x115   : > { %325 = vperm.xlu0 %937, %v316_v17   ;;  %581 = vperm.xlu1 %938, %v578_v19  }
 0x116   : > { %p950_p3 = pnand %p949_p2, %p943_p13 }
 0x119   : > { %667 = vperm.xlu0 %937, %v663_v18   ;;  %330 = vperm.xlu1 %938, %v317_v20   ;;  %v536_v20 = vrot.slane %v1183_v30, %v535_v7 }
 0x11d   : > { %672 = vperm.xlu1 %938, %v664_v21   ;;  %v540_v21 = vrot.slane %v1188_v31, %v535_v7 }
 0x167   : > { %v459_v23 = vpop.permute.xlu1 %458  ;;  %v440_v24 = vpop.permute.xlu0 %439 }
 0x16b   : > { %v476_v27 = vpop.permute.xlu1 %475  ;;  %v461_v29 = vpop.permute.xlu0 %460 }
 0x16c   : > { %v463_v40 = vsel %vm462_vm2, %v459_v23, %v461_v29  ;;  %v464_v41 = vsel %vm462_vm2, %v461_v29, %v459_v23 }
 0x16d   : > { %v473_v47 = vmul.f32 %v468_v35, %v464_v41  ;;  %v474_v51 = vmul.f32 %v472_v39, %v463_v40 }
 0x16f   : > { %v493_v36 = vpop.permute.xlu1 %492  ;;  %v478_v37 = vpop.permute.xlu0 %477 }
 0x170   : > { %v480_v52 = vsel %vm479_vm3, %v476_v27, %v478_v37  ;;  %v481_v61 = vsel %vm479_vm3, %v478_v37, %v476_v27 }
 0x171   : > { %v491_v62 = vmul.f32 %v489_v45, %v480_v52  ;;  %v490_v14 = vmul.f32 %v485_v60, %v481_v61  ;;  %v577_v45 = vld [vmem:[%s1309_s4] sm:$0xff] }
 0x173   : > { %v442_v48 = vpop.permute.xlu1 %441  ;;  %v495_v49 = vpop.permute.xlu0 %494 }
 0x174   : > { %v446_v53 = vsel %vm445_vm4, %v440_v24, %v442_v48  ;;  %v447_v54 = vsel %vm445_vm4, %v442_v48, %v440_v24  ;;  %v497_v55 = vsel %vm496_vm5, %v493_v36, %v495_v49  ;;  %v498_v57 = vsel %vm496_vm5, %v495_v49, %v493_v36 }
 0x175   : > { %v456_v56 = vmul.f32 %v451_v42, %v447_v54  ;;  %v508_v58 = vmul.f32 %v506_v43, %v497_v55  ;;  %v457_v59 = vmul.f32 %v455_v44, %v446_v53  ;;  %v507_v4 = vmul.f32 %v502_v46, %v498_v57  ;;  %v428_v46 = vpop.f32.mrb[4].mxu0  ;;  %v661_v55 = vld [vmem:[%s1311_s6] sm:$0xff] }
 0x176   : > { %v553_v24 = vrot.slane %v1183_v30, %v552_v12  ;;  %v860_v30 = vld [vmem:[%s1306_s1 + $0x18] ss:$0 sm:$0xff] }
 0x177   : > { %v510_v63 = vpop.permute.xlu1 %509  ;;  %v512_v1 = vpop.permute.xlu0 %511  ;;  %v870_v2 = vpack.c.bf16 %v474_v51, %v457_v59  ;;  %v872_v3 = vpack.c.bf16 %v473_v47, %v456_v56  ;;  %v874_v10 = vpack.c.bf16 %v508_v58, %v491_v62  ;;  %v876_v22 = vpack.c.bf16 %v507_v4, %v490_v14  ;;  %v662_v56 = vld [vmem:[%s1311_s6 + $0x8] sm:$0xff] }
 0x178   : > { %v515_v6 = vsel %vm513_vm6, %v512_v1, %v510_v63  ;;  %v514_v8 = vsel %vm513_vm6, %v510_v63, %v512_v1  ;;  %v430_v47 = vpop.f32.mrb[5].mxu0 }
 0x179   : > { %v525_v9 = vmul.f32 %v523_v50, %v515_v6  ;;  %871 = vmatprep.subr.bf16.mxu1 %v870_v2  ;;  %v524_v19 = vmul.f32 %v519_v5, %v514_v8 }
 0x17a   : > { %873 = vmatpush1.bf16.msra.mxu1 %v872_v3 }
 0x17b   : > { %v527_v17 = vpop.permute.xlu1 %526  ;;  %875 = vmatprep.subr.bf16.mxu1 %v874_v10  ;;  %v529_v18 = vpop.permute.xlu0 %528  ;;  %v878_v23 = vpack.c.bf16 %v525_v9, %v1134_v13  ;;  %v880_v35 = vpack.c.bf16 %v524_v19, %v1129_v11  ;;  %v859_v11 = vld [vmem:[%s1306_s1 + $0x10] ss:$0 sm:$0xff] }
 0x17c   : > { %v531_v27 = vsel %vm530_vm7, %v527_v17, %v529_v18  ;;  %v532_v28 = vsel %vm530_vm7, %v529_v18, %v527_v17 }
 0x17d   : > { %v541_v36 = vmul.f32 %v536_v20, %v531_v27  ;;  %v542_v13 = vmul.f32 %v540_v21, %v532_v28 }
 0x17e   : > { %877 = vmatpush1.bf16.msra.mxu1 %v876_v22 }
 0x17f   : > { %v544_v29 = vpop.permute.xlu1 %543  ;;  %879 = vmatprep.subr.bf16.mxu1 %v878_v23  ;;  %v546_v32 = vpop.permute.xlu0 %545 }
 0x180   : > { %v548_v33 = vsel %vm547_vm8, %v544_v29, %v546_v32  ;;  %v549_v34 = vsel %vm547_vm8, %v546_v32, %v544_v29 }
 0x181   : > { %v558_v37 = vmul.f32 %v553_v24, %v548_v33  ;;  %v559_v38 = vmul.f32 %v557_v25, %v549_v34 }
 0x182   : > { %881 = vmatpush1.bf16.msra.mxu1 %v880_v35 }
 0x183   : > { %v561_v31 = vpop.permute.xlu1 %560  ;;  %v563_v39 = vpop.permute.xlu0 %562  ;;  %v882_v40 = vpack.c.bf16 %v559_v38, %v542_v13  ;;  %v884_v41 = vpack.c.bf16 %v558_v37, %v541_v36 }
 0x184   : > { %v566_v42 = vsel %vm564_vm9, %v563_v39, %v561_v31  ;;  %v565_v43 = vsel %vm564_vm9, %v561_v31, %v563_v39 }
 0x185   : > { %v576_v26 = vmul.f32 %v860_v30, %v566_v42  ;;  %883 = vmatprep.subr.bf16.mxu1 %v882_v40  ;;  %v575_v44 = vmul.f32 %v859_v11, %v565_v43 }
 0x186   : > { %885 = vmatpush1.bf16.msra.mxu1 %v884_v41 }
 0x187   : > { %604 = vmatprep.subr.mxu1 %v576_v26 }
 0x18a   : > { %605 = vmatpush1.msra.mxu1 %v575_v44 }
 0x18b   : > { %861 = vmatmul.mubr.msk.f32.vlgmr.msra.gmra.mrb[0].mxu1 %vm584_vm10, %v577_v45 }
 0x194   : > { %v582_v48 = vpop.permute.xlu1 %581  ;;  %v326_v57 = vpop.permute.xlu0 %325 }
 0x195   : > { %v423_v58 = vadd.f32 %v1151_v15, %v326_v57  ;;  %v425_v59 = vadd.f32 %v1153_v16, %v326_v57 }
 0x197   : > { %v435_v63 = vmax.f32 %v423_v58, 0.0  ;;  %v436_v3 = vmax.f32 %v425_v59, 0.0 }
 0x198   : > { %v331_v60 = vpop.permute.xlu1 %330  ;;  %v668_v61 = vpop.permute.xlu0 %667 }
 0x199   : > { %v429_v1 = vadd.f32 %v428_v46, %v331_v60  ;;  %v431_v4 = vadd.f32 %v430_v47, %v331_v60 }
 0x19b   : > { %v437_v9 = vmax.f32 %v429_v1, 0.0  ;;  %v438_v14 = vmax.f32 %v431_v4, 0.0 }
 0x19c   : > { %v673_v7 = vpop.permute.xlu1 %672 }
 0x25e   : > { %v654_v49 = vpop.f32.mrb[0].mxu1 }
 0x25f   : > { %v655_v50 = vadd.f32 %v654_v49, %v582_v48  ;;  %v656_v51 = vpop.f32.mrb[1].mxu1 }
 0x260   : > { %v657_v52 = vadd.f32 %v656_v51, %v582_v48 }
 0x261   : > { %v659_v54 = vmax.f32 %v655_v50, 0.0 }
 0x262   : > { %v660_v53 = vmax.f32 %v657_v52, 0.0 }
 0x264   : > { %682 = vmatprep.subr.mxu0 %v660_v53 }
 0x265   : > { %683 = vmatpush1.msra.mxu0 %v659_v54 }
 0x266   : > { %862 = vmatmul.mubr.msk.f32.vlgmr.msra.gmra.mrb[6].mxu0 %vm675_vm11, %v661_v55 }
 0x267   : > { %752 = vmatprep.mubr.f32.mxu0 %v1004_v0 }
 0x26a   : > { %863 = vmatmul.mubr.msk.f32.gmra.mrb[8].mxu0 %vm675_vm11, %v662_v56 }
 0x339   : > { %v748_v62 = vpop.f32.mrb[6].mxu0 }
 0x33a   : > { %v749_v2 = vadd.f32 %v748_v62, %v668_v61  ;;  %v750_v0 = vpop.f32.mrb[7].mxu0 }
 0x33b   : > { %v751_v5 = vadd.f32 %v750_v0, %v668_v61 }
 0x33c   : > { %v759_v6 = vadd.f32 %v749_v2, %v435_v63 }
 0x33d   : > { %v760_v8 = vadd.f32 %v751_v5, %v436_v3  ;;  %v754_v15 = vpop.f32.mrb[8].mxu0 }
 0x33e   : > { %v763_v16 = vmax.f32 %v759_v6, 0.0  ;;  %v755_v10 = vadd.f32 %v754_v15, %v673_v7  ;;  %v756_v12 = vpop.f32.mrb[9].mxu0 }
 0x33f   : > { %v764_v17 = vmax.f32 %v760_v8, 0.0  ;;  %v757_v18 = vadd.f32 %v756_v12, %v673_v7 }
 0x340   : > { %767 = vst [vmem:[%s299_s10] sm:$0xff] %v763_v16  ;;  %v761_v19 = vadd.f32 %v755_v10, %v437_v9 }
 0x341   : > { %768 = vst [vmem:[%s299_s10 + $0x8] sm:$0xff] %v764_v17  ;;  %v762_v20 = vadd.f32 %v757_v18, %v438_v14 }
 0x342   : > { %v765_v21 = vmax.f32 %v761_v19, 0.0 }
 0x343   : > { %v766_v22 = vmax.f32 %v762_v20, 0.0 }
 0x344   : > { %769 = vst [vmem:[%s299_s10 + $0x10] sm:$0xff] %v765_v21 }
 0x345   : > { %770 = vst [vmem:[%s299_s10 + $0x18] sm:$0xff] %v766_v22 }
 0x346   : > { %953 = shalt.err (!%p950_p3)
}
 0x347   : > { %s954_s25 = scalar_lea.hbm %s1259_s20, 512  ;;  %s958_s17 = scalar_lea.hbm %s1313_s8, 1024 }
 0x348   : > { %p955_p4 = scmp.ne.s32.totalorder %s1259_s20, %s954_s25  ;;  %p959_p9 = scmp.lt.u32.totalorder %s1259_s20, %s1313_s8 }
 0x349   : > { %p960_p10 = scmp.lt.u32.totalorder %s958_s17, %s954_s25  ;;  %p962_p12 = scmp.lt.u32.totalorder %s954_s25, %s1259_s20 }
 0x34a   : > { %p956_p7 = pnand %p955_p4, %p1100_p5 }
 0x34b   : > { %p961_p11 = por %p960_p10, %p959_p9 }
 0x34c   : > { %p957_p8 = pneg %p956_p7 }
 0x34d   : > { %p963_p13 = por %p962_p12, %p961_p11 }
 0x34f   : > { %p964_p0 = pnand %p963_p13, %p957_p8 }
 0x351   : > { %967 = shalt.err (!%p964_p0)
}
 0x352   : > { %s1015_s21 = smov 256   ;;  %s1016_s22 = smov 512  }
 0x353   : > { %886 = dma.vmem_to_hbm [thread:$0]  (%p1100_p5), %s1254_s13, 512, %s1259_s20, %s1263_s9, %s1015_s21, %s1016_s22, %s1006_s12  }
 0x354 PF: > { %p892_p1 = scmp.ge.s32.totalorder %s1002_s30, 2  ;;  %s800_s23 = sand.u32 1, %s990_s27  }
 0x355   : > { %s801_s24 = scalar_lea.sflag [#allocation3], %s800_s23 }
 0x356   : > { %p889_p2 = pnand %p892_p1, %p1104_p6 }
 0x358   : > { %985 = dma.done.wait (!%p889_p2), %s801_s24, 512  }
 0x359   : > { %987 = vsyncadd (!%p889_p2), %s801_s24, 4294966784  ;;  %p18_p3 = scmp.ge.s32.totalorder %s1087_s11, 4   ;;  %s1316_s27 = smov %s994_s28 }
 0x35a   : > { %s1317_s28 = smov %s998_s29  ;;  %s1318_s29 = smov %s1098_s14 }
 0x35b   : > { %s1319_s30 = smov %s1087_s11  ;;  %20 = sbr.rel (!%p18_p3) target bundleno = 3 (0x3), region = 87 }
 0x362   :  { %806 = vsyncpa [#allocation3], 1 }
 0x363   :  { %808 = vsyncpa [#allocation3 + $0x1], 1 }

</bundles_post_ra>
